<compile_context>
chip_gen: v7x
topology: tpu7x:2x2x1
jax: 0.10.0
libtpu: 0.0.40
codegen_flags: <defaults>
</compile_context>

<pallas_src>
import functools
import math

import jax
import jax.numpy as jnp
from jax.experimental import pallas as pl
from jax.experimental.pallas import tpu as pltpu


_C1 = math.sqrt(2.0 / math.pi)
# tanh(z) = 2*sigmoid(2z) - 1  =>  0.5*x*(1+tanh(C1*(x+0.044715 x^3)))
#                               == x * sigmoid(x*(2*C1 + 2*C1*0.044715*x^2))
_K1 = 2.0 * _C1
_K2 = 2.0 * _C1 * 0.044715

# Candidate lane widths (multiples of 128), widest first.
_LANE_CANDIDATES = (2048, 1024, 512, 256, 128)


def _device_kind():
    try:
        return jax.devices()[0].device_kind.lower()
    except Exception:  # pragma: no cover -非TPU fallback
        return ""


_KIND = _device_kind()
_IS_V5_OR_OLDER = any(t in _KIND for t in ("v2", "v3", "v4", "v5"))
_SINGLE_TC = any(t in _KIND for t in ("v2", "v3", "v4", "v5", "v6"))

# Per-block byte target: 4 MiB (x2 specs x2 pipeline buffers = 16 MiB) fits
# the 32 MiB scoped-VMEM default on v6e/v7x; v5e's scoped default is 16 MiB,
# so stay at 2 MiB blocks there (its lower HBM BW hides per-step overhead).
_TARGET_BLOCK_BYTES = (2 if _IS_V5_OR_OLDER else 4) * 1024 * 1024

# Ragged (non-multiple-of-128) inputs up to this many raw bytes run as one
# whole-array (1, n) block; the (1, n) layout pads 8x in VMEM, so 512 KiB raw
# keeps the footprint <= ~8 MiB total on every generation.
_RAGGED_WHOLE_BLOCK_BYTES = 512 * 1024


def _gelu_kernel(x_ref, o_ref, *, compute_dtype):
    x = x_ref[...].astype(compute_dtype)
    # x*(K1 + K2*x*x) == 2*sqrt(2/pi)*(x + 0.044715*x^3), one fewer multiply.
    z = x * (_K1 + _K2 * (x * x))
    # sigmoid form of tanh-GELU: removes the "+1" add and the 0.5* multiply.
    o_ref[...] = (x * jax.nn.sigmoid(z)).astype(o_ref.dtype)


def _compute_dtype(dtype):
    dt = jnp.dtype(dtype)
    if _IS_V5_OR_OLDER:
        return jnp.float32  # no bf16 VPU/EUP on v5-class chips
    if dt in (jnp.dtype(jnp.bfloat16), jnp.dtype(jnp.float16)):
        return dtype  # bf16/f16 VPU+EUP on v6e/v7x: stay narrow, half the pushes
    return jnp.float32


def _sublane_multiple(itemsize):
    return {4: 8, 2: 16, 1: 32}.get(itemsize, 8)


def _pick_lanes(n, sub):
    divisors = [l for l in _LANE_CANDIDATES if n % l == 0]
    if not divisors:
        return None
    # Widest lane count that still fills at least one full sublane group.
    for lanes in divisors:
        if n // lanes >= sub:
            return lanes
    # Tiny inputs: narrowest divider maximizes sublane occupancy.
    return divisors[-1]


def _choose_block_rows(rows, lanes, itemsize, sub):
    target = max(sub, (_TARGET_BLOCK_BYTES // (lanes * itemsize)) // sub * sub)
    if rows <= target:
        if (not _SINGLE_TC) and rows >= 2 * sub:
            # Multi-TensorCore chip (v7x): 2 blocks so both cores get work.
            half = (((rows + 1) // 2) + sub - 1) // sub * sub
            return min(rows, half)
        # Single-TC chip or tiny input: one block (full dims is always legal).
        return rows
    return target


def _tiled_call(kernel, x2d, rows, lanes, dtype, itemsize, sub):
    block_rows = _choose_block_rows(rows, lanes, itemsize, sub)
    grid = (pl.cdiv(rows, block_rows),)
    return pl.pallas_call(
        kernel,
        out_shape=jax.ShapeDtypeStruct((rows, lanes), dtype),
        grid_spec=pltpu.PrefetchScalarGridSpec(
            num_scalar_prefetch=0,
            grid=grid,
            in_specs=[pl.BlockSpec((block_rows, lanes), lambda i: (i, 0))],
            out_specs=pl.BlockSpec((block_rows, lanes), lambda i: (i, 0)),
        ),
        compiler_params=pltpu.CompilerParams(
            dimension_semantics=("parallel",),
        ),
    )(x2d)


@jax.jit
def gelu_pallas(x):
    """Elementwise GELU (tanh approximation). Any shape / float dtype."""
    orig_shape = x.shape
    dtype = x.dtype
    n = x.size
    if n == 0:
        return x

    itemsize = jnp.dtype(dtype).itemsize
    sub = _sublane_multiple(itemsize)
    kernel = functools.partial(_gelu_kernel, compute_dtype=_compute_dtype(dtype))
    x_flat = jnp.ravel(x)

    lanes = _pick_lanes(n, sub)
    if lanes is not None:
        # Fast path: exactly one HBM read + one HBM write, lane-dense tiles.
        rows = n // lanes
        out2d = _tiled_call(kernel, x_flat.reshape(rows, lanes),
                            rows, lanes, dtype, itemsize, sub)
        return out2d.reshape(orig_shape)

    if n * itemsize <= _RAGGED_WHOLE_BLOCK_BYTES:
        # Ragged but small: whole array as a single (1, n) block — no pad, no
        # slice, still one read + one write.
        out2d = pl.pallas_call(
            kernel,
            out_shape=jax.ShapeDtypeStruct((1, n), dtype),
            in_specs=[pl.BlockSpec(memory_space=pltpu.MemorySpace.VMEM)],
            out_specs=pl.BlockSpec(memory_space=pltpu.MemorySpace.VMEM),
        )(x_flat.reshape(1, n))
        return out2d.reshape(orig_shape)

    # Rare: large tensor whose element count is not a multiple of 128.
    # Pad to a lane multiple (costs one extra HBM pass; acceptable fallback).
    lanes = 512
    n_pad = pl.cdiv(n, lanes) * lanes
    xp = jnp.pad(x_flat, (0, n_pad - n))
    rows = n_pad // lanes
    out2d = _tiled_call(kernel, xp.reshape(rows, lanes),
                        rows, lanes, dtype, itemsize, sub)
    return out2d.reshape(-1)[:n].reshape(orig_shape)


def gelu_ref(x):
    xf = x.astype(jnp.float32)
    y = 0.5 * xf * (1.0 + jnp.tanh(_C1 * (xf + 0.044715 * xf ** 3)))
    return y.astype(x.dtype)


if __name__ == "__main__":
    key = jax.random.PRNGKey(0)
    k0, k1, k2, k3 = jax.random.split(key, 4)

    # Primary case: small NCHW-style activation, f32.
    x = jax.random.normal(k0, (2, 4, 16, 16), dtype=jnp.float32)
    out = gelu_pallas(x)
    jax.block_until_ready(out)
    assert out.shape == x.shape and out.dtype == x.dtype
    assert jnp.allclose(out, gelu_ref(x), atol=1e-5, rtol=1e-5), "mismatch (2,4,16,16)"

    # Larger input exercising the wide-lane / multi-block tiling path.
    x2 = jax.random.normal(k1, (2, 64, 32, 32), dtype=jnp.float32)
    out2 = gelu_pallas(x2)
    jax.block_until_ready(out2)
    assert jnp.allclose(out2, gelu_ref(x2), atol=1e-5, rtol=1e-5), "mismatch multi-block"

    # Ragged element count (not a multiple of 128): single whole-array block,
    # no pad / no slice.
    x3 = jax.random.normal(k2, (3, 5, 7, 11), dtype=jnp.float32)
    out3 = gelu_pallas(x3)
    jax.block_until_ready(out3)
    assert out3.shape == x3.shape and out3.dtype == x3.dtype
    assert jnp.allclose(out3, gelu_ref(x3), atol=1e-5, rtol=1e-5), "mismatch ragged"

    # Low-precision input (stays in bf16 on v6e/v7x, f32 compute on v5-class).
    x4 = jax.random.normal(k3, (2, 8, 16, 16), dtype=jnp.bfloat16)
    out4 = gelu_pallas(x4)
    jax.block_until_ready(out4)
    assert out4.shape == x4.shape and out4.dtype == jnp.bfloat16
    assert jnp.allclose(out4.astype(jnp.float32), gelu_ref(x4).astype(jnp.float32),
                        atol=5e-2, rtol=5e-2), "mismatch bf16"

    print("KERNEL_OK")
</pallas_src>

<mosaic_0001>
module attributes {stable_mosaic.version = 11 : i64} {
  func.func @_gelu_kernel(%arg0: i32, %arg1: memref<8x256xf32, #tpu.memory_space<vmem>>, %arg2: memref<8x256xf32, #tpu.memory_space<vmem>>) attributes {dimension_semantics = [#tpu.dimension_semantics<parallel>], iteration_bounds = array<i64: 1>, scalar_prefetch = 0 : i64, scratch_operands = 0 : i64, tpu.core_type = #tpu.core_type<tc>, window_params = [{transform_indices = @transform_0, window_bounds = array<i64: 8, 256>}, {transform_indices = @transform_1, window_bounds = array<i64: 8, 256>}]} {
    %c0 = arith.constant 0 : index
    %c0_0 = arith.constant 0 : index
    %0 = vector.load %arg1[%c0, %c0_0] : memref<8x256xf32, #tpu.memory_space<vmem>>, vector<8x256xf32>
    %1 = arith.mulf %0, %0 : vector<8x256xf32>
    %cst = arith.constant 0.0713548139 : f32
    %2 = vector.broadcast %cst : f32 to vector<8x256xf32>
    %3 = arith.mulf %2, %1 : vector<8x256xf32>
    %cst_1 = arith.constant 1.59576917 : f32
    %4 = vector.broadcast %cst_1 : f32 to vector<8x256xf32>
    %5 = arith.addf %4, %3 : vector<8x256xf32>
    %6 = arith.mulf %0, %5 : vector<8x256xf32>
    %7 = arith.negf %6 : vector<8x256xf32>
    %8 = math.exp %7 : vector<8x256xf32>
    %cst_2 = arith.constant 1.000000e+00 : f32
    %9 = vector.broadcast %cst_2 : f32 to vector<8x256xf32>
    %10 = arith.addf %9, %8 : vector<8x256xf32>
    %11 = arith.divf %9, %10 : vector<8x256xf32>
    %12 = arith.mulf %0, %11 : vector<8x256xf32>
    %c0_3 = arith.constant 0 : index
    %c0_4 = arith.constant 0 : index
    %13 = vector.load %arg2[%c0_3, %c0_4] : memref<8x256xf32, #tpu.memory_space<vmem>>, vector<8x256xf32>
    tpu.vector_store %arg2[%c0_3, %c0_4], %12 {strides = array<i32>} : memref<8x256xf32, #tpu.memory_space<vmem>>, vector<8x256xf32>,
    return
  }
  func.func @transform_0(%arg0: i32) -> (i32, i32) {
    %c0_i32 = arith.constant 0 : i32
    %c0_i32_0 = arith.constant 0 : i32
    return %arg0, %c0_i32 : i32, i32
  }
  func.func @transform_1(%arg0: i32) -> (i32, i32) {
    %c0_i32 = arith.constant 0 : i32
    %c0_i32_0 = arith.constant 0 : i32
    return %arg0, %c0_i32 : i32, i32
  }
}

</mosaic_0001>

<bundles_post_ra>
// kernel: gelu_pallas.1
= control target key start
LH: loop header
LB: loop body
LE: loop exit
PB: predicated region body
PF: predicated region fallthrough
CT: control target
= control target key end

     0   :  { %s70_s0 = inlined_call_operand.vmem [shape: f32[8,256], index: 0, kind: input, shape index: {}]   ;;  %s71_s1 = inlined_call_operand.vmem [shape: f32[8,256], index: 1, kind: output, shape index: {}]  }
   0x1   :  { %v8_v0 = vld [vmem:[%s70_s0] sm:$0xff]  ;;  %v9_v1 = vld [vmem:[%s70_s0 + $0x8] sm:$0xff] }
   0x2   :  { %v10_v2 = vmul.f32 %v8_v0, %v8_v0  ;;  %v11_v3 = vmul.f32 %v9_v1, %v9_v1 }
   0x4   :  { %v12_v4 = vmul.f32 0.071354814, %v10_v2  ;;  %v13_v5 = vmul.f32 0.071354814, %v11_v3 }
   0x6   :  { %v14_v6 = vadd.f32 1.5957692, %v12_v4  ;;  %v15_v7 = vadd.f32 1.5957692, %v13_v5 }
   0x8   :  { %v16_v8 = vmul.f32 %v14_v6, %v8_v0  ;;  %v17_v9 = vmul.f32 %v15_v7, %v9_v1 }
   0xa   :  { %v38_v10 = vmul.f32 -1.442695, %v16_v8  ;;  %v39_v11 = vmul.f32 -1.442695, %v17_v9 }
   0xc   :  { %40 = vpow2.f32 %v38_v10 }
   0xd   :  { %42 = vpow2.f32 %v39_v11 }
  0x16   :  { %v41_v12 = vpop.eup %40 }
  0x17   :  { %v43_v13 = vpop.eup %42  ;;  %v24_v14 = vadd.f32 1.0, %v41_v12 }
  0x18   :  { %v25_v15 = vadd.f32 1.0, %v43_v13 }
  0x19   :  { %44 = vrcp.f32 %v24_v14 }
  0x1a   :  { %46 = vrcp.f32 %v25_v15 }
  0x23   :  { %v45_v16 = vpop.eup %44 }
  0x24   :  { %v47_v17 = vpop.eup %46  ;;  %v30_v18 = vmul.f32 %v45_v16, %v8_v0 }
  0x25   :  { %v31_v19 = vmul.f32 %v47_v17, %v9_v1 }
  0x26   :  { %32 = vst [vmem:[%s71_s1] sm:$0xff] %v30_v18 }
  0x27   :  { %33 = vst [vmem:[%s71_s1 + $0x8] sm:$0xff] %v31_v19 }

</bundles_post_ra>
